<compile_context>
chip_gen: v6e
topology: v6e:2x2x1
jax: 0.10.0
libtpu: 0.0.40
codegen_flags: <defaults>
</compile_context>

<pallas_src>
import functools

import jax
import jax.numpy as jnp
from jax.experimental import pallas as pl
from jax.experimental.pallas import tpu as pltpu


# ----------------------------------------------------------------------------
# Graph description (the `mData` dict AgentV2 would receive). Documentation of
# the graph that the fused kernel implements.
# ----------------------------------------------------------------------------
STATE_DIM = 32
HIDDEN = 32
ACT_DIM = 4
POL_DIM = 2 * ACT_DIM          # policy head width (8)
TB = 1024                      # fixed batch tile (multiple of 8)

mData = {
    "module00_feature": {"prior": 0, "input": [0],
                         "net": ("linear", STATE_DIM, HIDDEN, "relu")},
    "module01_policy": {"prior": 1, "prevNodeNames": ["module00_feature"],
                        "output": True,
                        "net": ("linear", HIDDEN, POL_DIM, None)},
    "module02_value": {"prior": 1, "prevNodeNames": ["module00_feature"],
                       "output": True,
                       "net": ("linear", HIDDEN, 1, None)},
}


# ----------------------------------------------------------------------------
# Pallas kernel: fused priority-0 + priority-1 forward (one batch tile)
# ----------------------------------------------------------------------------
def _agent_fwd_kernel(x_ref, w1_ref, b1_ref, wp_ref, bp_ref, wv_ref, bv_ref,
                      pol_ref, val_ref):
    # prior 0: "feature" node (Linear + ReLU), f32 on the MXU.
    h = jnp.dot(x_ref[...], w1_ref[...], preferred_element_type=jnp.float32)
    h = jnp.maximum(h + b1_ref[...], 0.0)

    # prior 1: "policy" and "value" nodes (both consume the shared feature).
    pol_ref[...] = (jnp.dot(h, wp_ref[...], preferred_element_type=jnp.float32)
                    + bp_ref[...])
    val_ref[...] = (jnp.dot(h, wv_ref[...], preferred_element_type=jnp.float32)
                    + bv_ref[...])


@functools.partial(jax.jit, static_argnames=("tb",))
def _agent_fwd(state, w1, b1, wp, bp, wv, bv, *, tb):
    """One pallas_call over a batch grid; returns (pol (B,8), val (B,1))."""
    b = state.shape[0]
    grid = (pl.cdiv(b, tb),)           # ragged last block handled by Pallas
    resident = lambda i: (0, 0)        # weights / biases: same block each step

    return pl.pallas_call(
        _agent_fwd_kernel,
        out_shape=(jax.ShapeDtypeStruct((b, POL_DIM), jnp.float32),
                   jax.ShapeDtypeStruct((b, 1), jnp.float32)),
        grid=grid,
        in_specs=[
            pl.BlockSpec((tb, STATE_DIM), lambda i: (i, 0)),   # state tile
            pl.BlockSpec((STATE_DIM, HIDDEN), resident),       # w1 resident
            pl.BlockSpec((1, HIDDEN), resident),               # b1 resident
            pl.BlockSpec((HIDDEN, POL_DIM), resident),         # wp resident
            pl.BlockSpec((1, POL_DIM), resident),              # bp resident
            pl.BlockSpec((HIDDEN, 1), resident),               # wv resident
            pl.BlockSpec((1, 1), resident),                    # bv resident
        ],
        out_specs=(
            pl.BlockSpec((tb, POL_DIM), lambda i: (i, 0)),     # policy tile
            pl.BlockSpec((tb, 1), lambda i: (i, 0)),           # value tile
        ),
        compiler_params=pltpu.CompilerParams(
            dimension_semantics=("parallel",)),                # v7x megacore
    )(state, w1, b1, wp, bp, wv, bv)


def agent_v2_forward(inputs, params, *, tile_b=TB):
    """Mimics AgentV2.forward: tuple of inputs -> tuple of outputs (one per
    node flagged output=True), in graph order (policy, value)."""
    (state,) = inputs  # input index 0 -> "module00_feature"
    w1, b1, wp, bp, wv, bv = params

    b = state.shape[0]
    # Fixed tile; shrink only when the whole batch is smaller than one tile
    # (a new B retraces jit anyway, so this adds no extra kernel compiles).
    tb = tile_b if b >= tile_b else b

    pol, val = _agent_fwd(state, w1, b1, wp, bp, wv, bv, tb=tb)
    # output collection order follows outputModelName -> (policy, value)
    return (pol, val)


# ----------------------------------------------------------------------------
# Deterministic parameter init (synthetic, no checkpoint load)
# ----------------------------------------------------------------------------
def init_params(key):
    k1, k2, k3 = jax.random.split(key, 3)
    w1 = jax.random.normal(k1, (STATE_DIM, HIDDEN), jnp.float32) * 0.1
    b1 = jnp.zeros((1, HIDDEN), jnp.float32)
    wp = jax.random.normal(k2, (HIDDEN, POL_DIM), jnp.float32) * 0.1
    bp = jnp.zeros((1, POL_DIM), jnp.float32)
    wv = jax.random.normal(k3, (HIDDEN, 1), jnp.float32) * 0.1
    bv = jnp.zeros((1, 1), jnp.float32)
    return (w1, b1, wp, bp, wv, bv)


def _reference_forward(inputs, params):
    """Pure-JAX f32 reference mirroring the torch module's math."""
    (state,) = inputs
    w1, b1, wp, bp, wv, bv = params
    hi = jax.lax.Precision.HIGHEST
    h = jnp.maximum(jnp.dot(state, w1, precision=hi) + b1, 0.0)
    pol = jnp.dot(h, wp, precision=hi) + bp
    val = jnp.dot(h, wv, precision=hi) + bv
    return (pol, val)


def _check(batch, pkey, xkey):
    params = init_params(pkey)
    state = jax.random.normal(xkey, (batch, STATE_DIM), jnp.float32)
    outputs = jax.block_until_ready(agent_v2_forward((state,), params))
    ref = _reference_forward((state,), params)
    assert len(outputs) == 2
    for o, r in zip(outputs, ref):
        assert o.shape == r.shape and o.dtype == r.dtype
        assert jnp.allclose(o, r, atol=2e-3, rtol=2e-3), \
            float(jnp.max(jnp.abs(o - r)))


if __name__ == "__main__":
    key = jax.random.PRNGKey(0)
    pkey, xkey = jax.random.split(key)

    # small primary shape (single exact tile)
    _check(8, pkey, xkey)
    # whole batch smaller than one tile, non-multiple-of-8 rows
    _check(300, pkey, xkey)
    # multi-step grid with a ragged last block (no jnp.pad pass)
    _check(1029, pkey, xkey)

    print("KERNEL_OK")
</pallas_src>

<mosaic_0001>
module attributes {stable_mosaic.version = 11 : i64} {
  func.func @_agent_fwd_kernel(%arg0: i32, %arg1: memref<8x32xf32, #tpu.memory_space<vmem>>, %arg2: memref<32x32xf32, #tpu.memory_space<vmem>>, %arg3: memref<1x32xf32, #tpu.memory_space<vmem>>, %arg4: memref<32x8xf32, #tpu.memory_space<vmem>>, %arg5: memref<1x8xf32, #tpu.memory_space<vmem>>, %arg6: memref<32x1xf32, #tpu.memory_space<vmem>>, %arg7: memref<1x1xf32, #tpu.memory_space<vmem>>, %arg8: memref<8x8xf32, #tpu.memory_space<vmem>>, %arg9: memref<8x1xf32, #tpu.memory_space<vmem>>) attributes {dimension_semantics = [#tpu.dimension_semantics<parallel>], iteration_bounds = array<i64: 1>, scalar_prefetch = 0 : i64, scratch_operands = 0 : i64, tpu.core_type = #tpu.core_type<tc>, window_params = [{transform_indices = @transform_0, window_bounds = array<i64: 8, 32>}, {pipeline_mode = #tpu.pipeline_mode<synchronous>, transform_indices = @transform_1, window_bounds = array<i64: 32, 32>}, {pipeline_mode = #tpu.pipeline_mode<synchronous>, transform_indices = @transform_2, window_bounds = array<i64: 1, 32>}, {pipeline_mode = #tpu.pipeline_mode<synchronous>, transform_indices = @transform_3, window_bounds = array<i64: 32, 8>}, {pipeline_mode = #tpu.pipeline_mode<synchronous>, transform_indices = @transform_4, window_bounds = array<i64: 1, 8>}, {pipeline_mode = #tpu.pipeline_mode<synchronous>, transform_indices = @transform_5, window_bounds = array<i64: 32, 1>}, {pipeline_mode = #tpu.pipeline_mode<synchronous>, transform_indices = @transform_6, window_bounds = array<i64: 1, 1>}, {transform_indices = @transform_7, window_bounds = array<i64: 8, 8>}, {transform_indices = @transform_8, window_bounds = array<i64: 8, 1>}]} {
    %c0 = arith.constant 0 : index
    %c0_0 = arith.constant 0 : index
    %0 = vector.load %arg1[%c0, %c0_0] : memref<8x32xf32, #tpu.memory_space<vmem>>, vector<8x32xf32>
    %c0_1 = arith.constant 0 : index
    %c0_2 = arith.constant 0 : index
    %1 = vector.load %arg2[%c0_1, %c0_2] : memref<32x32xf32, #tpu.memory_space<vmem>>, vector<32x32xf32>
    %cst = arith.constant dense<0.000000e+00> : vector<8x32xf32>
    %2 = tpu.matmul %0, %1, %cst {dimension_numbers = #tpu.dot_dimension_numbers<[1], [0], [0], [1], [0, 0, 1, 1], [], []>} : vector<8x32xf32>, vector<32x32xf32>, vector<8x32xf32> -> vector<8x32xf32>
    %c0_3 = arith.constant 0 : index
    %c0_4 = arith.constant 0 : index
    %3 = vector.load %arg3[%c0_3, %c0_4] : memref<1x32xf32, #tpu.memory_space<vmem>>, vector<1x32xf32>
    %4 = vector.broadcast %3 : vector<1x32xf32> to vector<8x32xf32>
    %5 = arith.addf %2, %4 : vector<8x32xf32>
    %cst_5 = arith.constant 0.000000e+00 : f32
    %6 = vector.broadcast %cst_5 : f32 to vector<8x32xf32>
    %7 = arith.maximumf %5, %6 : vector<8x32xf32>
    %c0_6 = arith.constant 0 : index
    %c0_7 = arith.constant 0 : index
    %8 = vector.load %arg4[%c0_6, %c0_7] : memref<32x8xf32, #tpu.memory_space<vmem>>, vector<32x8xf32>
    %cst_8 = arith.constant dense<0.000000e+00> : vector<8x8xf32>
    %9 = tpu.matmul %7, %8, %cst_8 {dimension_numbers = #tpu.dot_dimension_numbers<[1], [0], [0], [1], [0, 0, 1, 1], [], []>} : vector<8x32xf32>, vector<32x8xf32>, vector<8x8xf32> -> vector<8x8xf32>
    %c0_9 = arith.constant 0 : index
    %c0_10 = arith.constant 0 : index
    %10 = vector.load %arg5[%c0_9, %c0_10] : memref<1x8xf32, #tpu.memory_space<vmem>>, vector<1x8xf32>
    %11 = vector.broadcast %10 : vector<1x8xf32> to vector<8x8xf32>
    %12 = arith.addf %9, %11 : vector<8x8xf32>
    %c0_11 = arith.constant 0 : index
    %c0_12 = arith.constant 0 : index
    %13 = vector.load %arg8[%c0_11, %c0_12] : memref<8x8xf32, #tpu.memory_space<vmem>>, vector<8x8xf32>
    tpu.vector_store %arg8[%c0_11, %c0_12], %12 {strides = array<i32>} : memref<8x8xf32, #tpu.memory_space<vmem>>, vector<8x8xf32>,
    %c0_13 = arith.constant 0 : index
    %c0_14 = arith.constant 0 : index
    %14 = vector.load %arg6[%c0_13, %c0_14] : memref<32x1xf32, #tpu.memory_space<vmem>>, vector<32x1xf32>
    %cst_15 = arith.constant dense<0.000000e+00> : vector<8x1xf32>
    %15 = tpu.matmul %7, %14, %cst_15 {dimension_numbers = #tpu.dot_dimension_numbers<[1], [0], [0], [1], [0, 0, 1, 1], [], []>} : vector<8x32xf32>, vector<32x1xf32>, vector<8x1xf32> -> vector<8x1xf32>
    %c0_16 = arith.constant 0 : index
    %c0_17 = arith.constant 0 : index
    %16 = vector.load %arg7[%c0_16, %c0_17] : memref<1x1xf32, #tpu.memory_space<vmem>>, vector<1x1xf32>
    %17 = vector.broadcast %16 : vector<1x1xf32> to vector<8x1xf32>
    %18 = arith.addf %15, %17 : vector<8x1xf32>
    %c0_18 = arith.constant 0 : index
    %c0_19 = arith.constant 0 : index
    %19 = vector.load %arg9[%c0_18, %c0_19] : memref<8x1xf32, #tpu.memory_space<vmem>>, vector<8x1xf32>
    tpu.vector_store %arg9[%c0_18, %c0_19], %18 {strides = array<i32>} : memref<8x1xf32, #tpu.memory_space<vmem>>, vector<8x1xf32>,
    return
  }
  func.func @transform_0(%arg0: i32) -> (i32, i32) {
    %c0_i32 = arith.constant 0 : i32
    %c0_i32_0 = arith.constant 0 : i32
    return %arg0, %c0_i32 : i32, i32
  }
  func.func @transform_1(%arg0: i32) -> (i32, i32) {
    %c0_i32 = arith.constant 0 : i32
    %c0_i32_0 = arith.constant 0 : i32
    %c0_i32_1 = arith.constant 0 : i32
    return %c0_i32, %c0_i32_0 : i32, i32
  }
  func.func @transform_2(%arg0: i32) -> (i32, i32) {
    %c0_i32 = arith.constant 0 : i32
    %c0_i32_0 = arith.constant 0 : i32
    %c0_i32_1 = arith.constant 0 : i32
    return %c0_i32, %c0_i32_0 : i32, i32
  }
  func.func @transform_3(%arg0: i32) -> (i32, i32) {
    %c0_i32 = arith.constant 0 : i32
    %c0_i32_0 = arith.constant 0 : i32
    %c0_i32_1 = arith.constant 0 : i32
    return %c0_i32, %c0_i32_0 : i32, i32
  }
  func.func @transform_4(%arg0: i32) -> (i32, i32) {
    %c0_i32 = arith.constant 0 : i32
    %c0_i32_0 = arith.constant 0 : i32
    %c0_i32_1 = arith.constant 0 : i32
    return %c0_i32, %c0_i32_0 : i32, i32
  }
  func.func @transform_5(%arg0: i32) -> (i32, i32) {
    %c0_i32 = arith.constant 0 : i32
    %c0_i32_0 = arith.constant 0 : i32
    %c0_i32_1 = arith.constant 0 : i32
    return %c0_i32, %c0_i32_0 : i32, i32
  }
  func.func @transform_6(%arg0: i32) -> (i32, i32) {
    %c0_i32 = arith.constant 0 : i32
    %c0_i32_0 = arith.constant 0 : i32
    %c0_i32_1 = arith.constant 0 : i32
    return %c0_i32, %c0_i32_0 : i32, i32
  }
  func.func @transform_7(%arg0: i32) -> (i32, i32) {
    %c0_i32 = arith.constant 0 : i32
    %c0_i32_0 = arith.constant 0 : i32
    return %arg0, %c0_i32 : i32, i32
  }
  func.func @transform_8(%arg0: i32) -> (i32, i32) {
    %c0_i32 = arith.constant 0 : i32
    %c0_i32_0 = arith.constant 0 : i32
    return %arg0, %c0_i32 : i32, i32
  }
}

</mosaic_0001>

<bundles_post_ra>
// kernel: _agent_fwd.1
= control target key start
LH: loop header
LB: loop body
LE: loop exit
PB: predicated region body
PF: predicated region fallthrough
CT: control target
= control target key end

     0   :  { %s492_s0 = inlined_call_operand.vmem [shape: f32[8,32], index: 0, kind: input, shape index: {}]   ;;  %s493_s1 = inlined_call_operand.vmem [shape: f32[32,32], index: 1, kind: input, shape index: {}]   ;;  %s494_s2 = inlined_call_operand.vmem [shape: f32[1,32], index: 2, kind: input, shape index: {}]   ;;  %s495_s3 = inlined_call_operand.vmem [shape: f32[32,8], index: 3, kind: input, shape index: {}]   ;;  %s496_s4 = inlined_call_operand.vmem [shape: f32[1,8], index: 4, kind: input, shape index: {}]   ;;  %s497_s5 = inlined_call_operand.vmem [shape: f32[32,1], index: 5, kind: input, shape index: {}]   ;;  %s498_s6 = inlined_call_operand.<no memory space> [shape: f32[1,1], index: 6, kind: input, shape index: {}]   ;;  %s499_s7 = inlined_call_operand.hbm [shape: f32[8,8], index: 7, kind: output, shape index: {0}]   ;;  %s500_s8 = inlined_call_operand.vmem [shape: f32[8,1], index: 8, kind: output, shape index: {1}]  }
   0x1   :  { %v14_v0 = vstv %s498_s6 }
   0x2   :  { %15 = vst [vmem:[#allocation2] sm:$0x1] %v14_v0 }
   0x3   :  { %v35_v1 = vld [vmem:[%s493_s1 + $0x18] sm:$0xff]  ;;  %v384_v2 = vmov 0.0   ;;  %v34_v3 = vld [vmem:[%s493_s1 + $0x10] sm:$0xff]  ;;  %vm385_vm0 = vmmov 0  }
   0x4   :  { %326 = vmatprep.subr.mxu0 %v384_v2  ;;  %334 = vmatprep.mubr.msk.f32.mxu0 %vm385_vm0, %v384_v2  ;;  %v121_v4 = vld [vmem:[%s495_s3 + $0x18] sm:$0xff] }
   0x5   :  { %327 = vmatpush3.msra.mxu0 %v35_v1  ;;  %337 = vmatprep.subr.mxu1 %v384_v2 }
   0x6   :  { %16 = vsyncpa [#allocation4], 0  ;;  %328 = vmatprep.subr.mxu0 %v384_v2  ;;  %v33_v5 = vld [vmem:[%s493_s1 + $0x8] sm:$0xff]  ;;  %338 = vmatpush3.msra.mxu1 %v121_v4  ;;  %v32_v6 = vld [vmem:[%s493_s1] sm:$0xff]  ;;  %vm43_vm1 = vcmask 261120   ;;  %vm285_vm2 = vcmask 7168  }
   0x7   :  { %329 = vmatpush3.msra.mxu0 %v34_v3  ;;  %339 = vmatprep.subr.mxu1 %v384_v2  ;;  %v31_v7 = vld [vmem:[%s492_s0] sm:$0xff]  ;;  %v207_v8 = vld [vmem:[%s497_s5 + $0x18] sm:$0xff]  ;;  %v120_v9 = vld [vmem:[%s495_s3 + $0x10] sm:$0xff]  ;;  %vm202_vm3 = vcmask 64512  }
   0x8   :  { %330 = vmatprep.subr.mxu0 %v384_v2  ;;  %345 = vmatprep.mubr.msk.f32.mxu1 %vm385_vm0, %v384_v2  ;;  %v206_v10 = vld [vmem:[%s497_s5 + $0x10] sm:$0xff]  ;;  %v119_v11 = vld [vmem:[%s495_s3 + $0x8] sm:$0xff]  ;;  %v118_v13 = vld [vmem:[%s495_s3] sm:$0xff] }
   0x9   :  { %331 = vmatpush3.msra.mxu0 %v33_v5  ;;  %340 = vmatpush3.msra.mxu1 %v120_v9  ;;  %v205_v12 = vld [vmem:[%s497_s5 + $0x8] sm:$0xff]  ;;  %v204_v14 = vld [vmem:[%s497_s5] sm:$0xff]  ;;  %s386_s5 = smov [#allocation3]  }
   0xa   :  { %332 = vmatprep.subr.mxu0 %v384_v2  ;;  %341 = vmatprep.subr.mxu1 %v384_v2  ;;  %v305_v15 = vld [vmem:[%s494_s2] ss:$0 sm:$0xff]  ;;  %s293_s11 = sshll.u32 %s386_s5, 4  ;;  %s294_s11 = int_to_ptr.vmem [resolvable:$true] %s293_s11 }
   0xb   :  { %333 = vmatpush3.msra.mxu0 %v32_v6  ;;  %342 = vmatpush3.msra.mxu1 %v119_v11  ;;  %v307_v20 = vld [vmem:[%s496_s4] ss:$0 sm:$0xff]  ;;  %s362_s6 = scalar_lea.vmem %s294_s11, 128  ;;  %p367_p1 = scmp.lt.s32.totalorder %s294_s11, %s294_s11 }
   0xc   :  { %335 = vmatmul.mubr.msk.f32.vlgmr.msra.gmra.mxu0 %vm43_vm1, %v31_v7  ;;  %348 = vmatprep.subr.mxu0 %v384_v2  ;;  %v309_v21 = vld [vmem:[#allocation2] ss:$0 sm:$0xff]  ;;  %p363_p0 = scmp.ne.s32.totalorder %s294_s11, %s362_s6  ;;  %p368_p2 = scmp.lt.s32.totalorder %s362_s6, %s362_s6 }
   0xd   :  { %349 = vmatpush3.msra.mxu0 %v207_v8  ;;  %356 = vmatprep.mubr.msk.f32.mxu0 %vm385_vm0, %v384_v2 }
   0xe   :  { %350 = vmatprep.subr.mxu0 %v384_v2  ;;  %343 = vmatprep.subr.mxu1 %v384_v2  ;;  %p369_p3 = por %p368_p2, %p367_p1 }
   0xf   :  { %351 = vmatpush3.msra.mxu0 %v206_v10  ;;  %344 = vmatpush3.msra.mxu1 %v118_v13 }
  0x10   :  { %352 = vmatprep.subr.mxu0 %v384_v2  ;;  %p370_p4 = pnand %p369_p3, %p363_p0 }
  0x11   :  { %353 = vmatpush3.msra.mxu0 %v205_v12 }
  0x12   :  { %354 = vmatprep.subr.mxu0 %v384_v2 }
  0x13   :  { %355 = vmatpush3.msra.mxu0 %v204_v14 }
  0xcc   :  { %v113_v16 = vpop.f32.mrf.mxu0 }
  0xcd   :  { %v114_v17 = vadd.f32 %v305_v15, %v113_v16 }
  0xce   :  { %v336_v18 = vpop.f32.mrf.mxu0 }
  0xcf   :  { %v117_v19 = vmax.f32 %v114_v17, 0.0 }
  0xd1   :  { %346 = vmatmul.mubr.msk.f32.vlgmr.msra.gmra.mxu1 %vm43_vm1, %v117_v19  ;;  %357 = vmatmul.mubr.msk.f32.vlgmr.msra.gmra.mxu0 %vm43_vm1, %v117_v19 }
 0x191   :  { %v198_v22 = vpop.f32.mrf.mxu1  ;;  %v281_v23 = vpop.f32.mrf.mxu0 }
 0x192   :  { %v199_v24 = vadd.f32 %v307_v20, %v198_v22  ;;  %v282_v25 = vadd.f32 %v309_v21, %v281_v23 }
 0x193   :  { %v347_v26 = vpop.f32.mrf.mxu1  ;;  %v358_v27 = vpop.f32.mrf.mxu0 }
 0x194   :  { %286 = vst.msk [vmem:[%s500_s8] sm:$0xff] %vm285_vm2, %v282_v25 }
 0x195   :  { %203 = vst.msk [vmem:[#allocation3] sm:$0xff] %vm202_vm3, %v199_v24 }
 0x196   :  { %373 = shalt.err (!%p370_p4)
}
 0x197   :  { %296 = dma.vmem_to_hbm [thread:$0]  %s294_s11, 128, %s499_s7, [#allocation4]  }
 0x198   :  { %382 = dma.done.wait [#allocation4], 128  }
 0x199   :  { %383 = vsyncadd [#allocation4], 4294967168 }
 0x19a   :  { %304 = vsyncpa [#allocation4], 1 }

</bundles_post_ra>
